<compile_context>
chip_gen: v7x
topology: tpu7x:2x2x1
jax: 0.10.0
libtpu: 0.0.40
codegen_flags: <defaults>
</compile_context>

<pallas_src>
import jax
import jax.numpy as jnp
import numpy as np
from jax.experimental import pallas as pl
from jax.experimental.pallas import tpu as pltpu


# ---------------------------------------------------------------------------
# DDPM schedules (buffers registered in the PyTorch module __init__)
# ---------------------------------------------------------------------------
def ddpm_schedules(beta1, beta2, T):
    beta = jnp.linspace(beta1, beta2, T + 1, dtype=jnp.float32)
    alpha = 1.0 - beta
    alpha_bar = jnp.cumprod(alpha)
    sigma = jnp.sqrt(beta)
    return {"beta": beta, "alpha": alpha, "alpha_bar": alpha_bar, "sigma": sigma}


# ---------------------------------------------------------------------------
# Pallas kernel: forward diffusion + eps_model + full MSE reduction
#   x_ref, eps_ref : (C, N)       f32, N = B*HW, lane-dense
#   sab_ref,s1ab_ref: (1, N)      f32, per-batch scalars pre-broadcast per lane
#   cond_ref       : (hidden, N)  f32, gated class emb + time emb + b1
#   w1t_ref        : (hidden, C)  bf16
#   w2t_ref        : (C, hidden)  bf16
#   b2_ref         : (C, 1)       f32
#   out_ref        : (1, 1)       f32 scalar loss in SMEM
# ---------------------------------------------------------------------------
def ddpm_loss_kernel(x_ref, eps_ref, sab_ref, s1ab_ref, cond_ref,
                     w1t_ref, w2t_ref, b2_ref, out_ref):
    x = x_ref[...]
    eps = eps_ref[...]

    # forward diffusion: x_t = sqrt(ab[t]) * x + sqrt(1 - ab[t]) * eps  (f32)
    x_t = sab_ref[...] * x + s1ab_ref[...] * eps                      # (C, N)

    # eps_model: 1x1-conv MLP, channels-first so the MXU N axis is B*HW = 512
    h = jnp.dot(w1t_ref[...], x_t.astype(jnp.bfloat16),
                preferred_element_type=jnp.float32)                   # (hidden, N)
    h = jnp.maximum(h + cond_ref[...], 0.0)                           # b1 folded into cond
    eps_hat = jnp.dot(w2t_ref[...], h.astype(jnp.bfloat16),
                      preferred_element_type=jnp.float32) + b2_ref[...]  # (C, N)

    # full MSE reduction in-kernel -> single scalar (nn.MSELoss 'mean')
    diff = eps - eps_hat
    n_elems = diff.shape[0] * diff.shape[1]
    out_ref[0, 0] = jnp.sum(diff * diff) * (1.0 / float(n_elems))


# ---------------------------------------------------------------------------
# Wrapper (JAX glue: RNG, schedule lookup, tiny embedding gather, layout)
# ---------------------------------------------------------------------------
def classifier_free_ddpm_loss(x_nchw, y, params, key, *, T, drop_prob):
    B, C, H, W = x_nchw.shape
    HW = H * W
    N = B * HW
    hidden = params["w1"].shape[1]

    k_t, k_eps, k_mask = jax.random.split(key, 3)
    # matches torch.randint(1, self.T, (B,)) -> samples in [1, T-1]
    t = jax.random.randint(k_t, (B,), 1, T)
    eps_nchw = jax.random.normal(k_eps, x_nchw.shape, dtype=jnp.float32)
    context_mask = jax.random.bernoulli(k_mask, drop_prob, y.shape).astype(jnp.float32)

    alpha_bar = params["alpha_bar"]
    sqrt_ab = jnp.sqrt(alpha_bar[t]).astype(jnp.float32)
    sqrt_1mab = jnp.sqrt(1.0 - alpha_bar[t]).astype(jnp.float32)
    t_norm = t.astype(jnp.float32) / float(T)

    # conditioning vector: gated class embedding + time embedding, b1 folded in
    cond = ((1.0 - context_mask)[:, None] * params["class_emb"][y]
            + t_norm[:, None] * params["time_emb"][None, :]
            + params["b1"])                                           # (B, hidden) f32

    # channels-first with batch folded into the lane axis: (C, B*HW)
    x_cf = jnp.transpose(x_nchw.reshape(B, C, HW), (1, 0, 2)).reshape(C, N)
    eps_cf = jnp.transpose(eps_nchw.reshape(B, C, HW), (1, 0, 2)).reshape(C, N)

    # per-batch scalars / conditioning pre-broadcast to lane-dense rows
    sab_row = jnp.repeat(sqrt_ab, HW).reshape(1, N)
    s1ab_row = jnp.repeat(sqrt_1mab, HW).reshape(1, N)
    cond_cf = jnp.repeat(cond.T, HW, axis=1)                          # (hidden, N)

    # transposed weights, bf16 for the MXU (accumulation stays f32)
    w1t = params["w1"].T.astype(jnp.bfloat16)                         # (hidden, C)
    w2t = params["w2"].T.astype(jnp.bfloat16)                         # (C, hidden)
    b2col = params["b2"].reshape(C, 1).astype(jnp.float32)

    in_specs = [pl.BlockSpec(memory_space=pltpu.MemorySpace.VMEM) for _ in range(8)]
    out = pl.pallas_call(
        ddpm_loss_kernel,
        out_shape=jax.ShapeDtypeStruct((1, 1), jnp.float32),
        in_specs=in_specs,
        out_specs=pl.BlockSpec(memory_space=pltpu.MemorySpace.SMEM),
    )(x_cf, eps_cf, sab_row, s1ab_row, cond_cf, w1t, w2t, b2col)

    loss = out[0, 0]
    aux = dict(eps_nchw=eps_nchw, sqrt_ab=sqrt_ab, sqrt_1mab=sqrt_1mab, cond=cond)
    return loss, aux


# ---------------------------------------------------------------------------
# Pure-JAX reference of the same math (natural batched layout) for a check
# ---------------------------------------------------------------------------
def reference_loss(x_nchw, eps_nchw, sqrt_ab, sqrt_1mab, cond, params):
    B, C, H, W = x_nchw.shape
    HW = H * W
    x_t = (sqrt_ab[:, None, None, None] * x_nchw
           + sqrt_1mab[:, None, None, None] * eps_nchw).reshape(B, C, HW)
    w1t = params["w1"].T.astype(jnp.bfloat16)
    w2t = params["w2"].T.astype(jnp.bfloat16)
    h = jnp.einsum("hc,bcp->bhp", w1t, x_t.astype(jnp.bfloat16),
                   preferred_element_type=jnp.float32)
    h = jnp.maximum(h + cond[:, :, None], 0.0)
    eps_hat = (jnp.einsum("ch,bhp->bcp", w2t, h.astype(jnp.bfloat16),
                          preferred_element_type=jnp.float32)
               + params["b2"].reshape(1, C, 1))
    return jnp.mean((eps_nchw.reshape(B, C, HW) - eps_hat) ** 2)


# ---------------------------------------------------------------------------
# Main
# ---------------------------------------------------------------------------
if __name__ == "__main__":
    B, C, H, W = 2, 4, 16, 16
    HIDDEN = 32
    NUM_CLASSES = 10
    T = 100
    BETAS = (1e-4, 0.02)
    DROP_PROB = 0.1

    key = jax.random.PRNGKey(0)
    k_x, k_y, k_w1, k_w2, k_ce, k_te, k_fwd = jax.random.split(key, 7)

    # deterministic synthetic parameters (eps_model weights + DDPM buffers)
    sched = ddpm_schedules(BETAS[0], BETAS[1], T)
    params = {
        "alpha_bar": sched["alpha_bar"],
        "w1": jax.random.normal(k_w1, (C, HIDDEN), jnp.float32) * 0.2,
        "b1": jnp.zeros((1, HIDDEN), jnp.float32),
        "w2": jax.random.normal(k_w2, (HIDDEN, C), jnp.float32) * 0.2,
        "b2": jnp.zeros((1, C), jnp.float32),
        "class_emb": jax.random.normal(k_ce, (NUM_CLASSES, HIDDEN), jnp.float32) * 0.2,
        "time_emb": jax.random.normal(k_te, (HIDDEN,), jnp.float32) * 0.2,
    }

    # example inputs (PyTorch-style NCHW image, integer class labels)
    x_nchw = jax.random.normal(k_x, (B, C, H, W), jnp.float32)
    y = jax.random.randint(k_y, (B,), 0, NUM_CLASSES)

    loss, aux = classifier_free_ddpm_loss(x_nchw, y, params, k_fwd,
                                          T=T, drop_prob=DROP_PROB)
    loss = jax.block_until_ready(loss)

    ref = jax.block_until_ready(
        reference_loss(x_nchw, aux["eps_nchw"], aux["sqrt_ab"], aux["sqrt_1mab"],
                       aux["cond"], params))
    np.testing.assert_allclose(np.asarray(loss), np.asarray(ref),
                               rtol=1e-3, atol=1e-5)

    # TODO(synk): `sample()` (reverse diffusion loop with guidance) is inference-time
    # control flow around eps_model and is not part of forward(); not kernelized here.
    print("KERNEL_OK")
</pallas_src>

<mosaic_0001>
module attributes {stable_mosaic.version = 11 : i64} {
  func.func @ddpm_loss_kernel(%arg0: memref<4x512xf32, #tpu.memory_space<vmem>>, %arg1: memref<4x512xf32, #tpu.memory_space<vmem>>, %arg2: memref<1x512xf32, #tpu.memory_space<vmem>>, %arg3: memref<1x512xf32, #tpu.memory_space<vmem>>, %arg4: memref<32x512xf32, #tpu.memory_space<vmem>>, %arg5: memref<32x4xbf16, #tpu.memory_space<vmem>>, %arg6: memref<4x32xbf16, #tpu.memory_space<vmem>>, %arg7: memref<4x1xf32, #tpu.memory_space<vmem>>, %arg8: memref<1x1xf32, #tpu.memory_space<smem>>) attributes {dimension_semantics = [], scalar_prefetch = 0 : i64, scratch_operands = 0 : i64, tpu.core_type = #tpu.core_type<tc>} {
    %c0 = arith.constant 0 : index
    %c0_0 = arith.constant 0 : index
    %0 = vector.load %arg0[%c0, %c0_0] : memref<4x512xf32, #tpu.memory_space<vmem>>, vector<4x512xf32>
    %c0_1 = arith.constant 0 : index
    %c0_2 = arith.constant 0 : index
    %1 = vector.load %arg1[%c0_1, %c0_2] : memref<4x512xf32, #tpu.memory_space<vmem>>, vector<4x512xf32>
    %c0_3 = arith.constant 0 : index
    %c0_4 = arith.constant 0 : index
    %2 = vector.load %arg2[%c0_3, %c0_4] : memref<1x512xf32, #tpu.memory_space<vmem>>, vector<1x512xf32>
    %3 = vector.broadcast %2 : vector<1x512xf32> to vector<4x512xf32>
    %4 = arith.mulf %3, %0 : vector<4x512xf32>
    %c0_5 = arith.constant 0 : index
    %c0_6 = arith.constant 0 : index
    %5 = vector.load %arg3[%c0_5, %c0_6] : memref<1x512xf32, #tpu.memory_space<vmem>>, vector<1x512xf32>
    %6 = vector.broadcast %5 : vector<1x512xf32> to vector<4x512xf32>
    %7 = arith.mulf %6, %1 : vector<4x512xf32>
    %8 = arith.addf %4, %7 : vector<4x512xf32>
    %c0_7 = arith.constant 0 : index
    %c0_8 = arith.constant 0 : index
    %9 = vector.load %arg5[%c0_7, %c0_8] : memref<32x4xbf16, #tpu.memory_space<vmem>>, vector<32x4xbf16>
    %10 = arith.truncf %8 : vector<4x512xf32> to vector<4x512xbf16>
    %cst = arith.constant dense<0.000000e+00> : vector<32x512xf32>
    %11 = tpu.matmul %9, %10, %cst {dimension_numbers = #tpu.dot_dimension_numbers<[1], [0], [0], [1], [0, 0, 1, 1], [], []>} : vector<32x4xbf16>, vector<4x512xbf16>, vector<32x512xf32> -> vector<32x512xf32>
    %c0_9 = arith.constant 0 : index
    %c0_10 = arith.constant 0 : index
    %12 = vector.load %arg4[%c0_9, %c0_10] : memref<32x512xf32, #tpu.memory_space<vmem>>, vector<32x512xf32>
    %13 = arith.addf %11, %12 : vector<32x512xf32>
    %cst_11 = arith.constant 0.000000e+00 : f32
    %14 = vector.broadcast %cst_11 : f32 to vector<32x512xf32>
    %15 = arith.maximumf %13, %14 : vector<32x512xf32>
    %c0_12 = arith.constant 0 : index
    %c0_13 = arith.constant 0 : index
    %16 = vector.load %arg6[%c0_12, %c0_13] : memref<4x32xbf16, #tpu.memory_space<vmem>>, vector<4x32xbf16>
    %17 = arith.truncf %15 : vector<32x512xf32> to vector<32x512xbf16>
    %cst_14 = arith.constant dense<0.000000e+00> : vector<4x512xf32>
    %18 = tpu.matmul %16, %17, %cst_14 {dimension_numbers = #tpu.dot_dimension_numbers<[1], [0], [0], [1], [0, 0, 1, 1], [], []>} : vector<4x32xbf16>, vector<32x512xbf16>, vector<4x512xf32> -> vector<4x512xf32>
    %c0_15 = arith.constant 0 : index
    %c0_16 = arith.constant 0 : index
    %19 = vector.load %arg7[%c0_15, %c0_16] : memref<4x1xf32, #tpu.memory_space<vmem>>, vector<4x1xf32>
    %20 = vector.broadcast %19 : vector<4x1xf32> to vector<4x512xf32>
    %21 = arith.addf %18, %20 : vector<4x512xf32>
    %22 = arith.subf %1, %21 : vector<4x512xf32>
    %23 = arith.mulf %22, %22 : vector<4x512xf32>
    %24 = vector.shape_cast %23 : vector<4x512xf32> to vector<1x4x512xf32>
    %cst_17 = arith.constant dense<0.000000e+00> : vector<1xf32>
    %25 = vector.multi_reduction <add>, %24, %cst_17 [1, 2] : vector<1x4x512xf32> to vector<1xf32>
    %26 = vector.shape_cast %25 : vector<1xf32> to vector<1x1x1xf32>
    %27 = vector.extract %26[0, 0, 0] : f32 from vector<1x1x1xf32>
    %cst_18 = arith.constant 4.8828125E-4 : f32
    %28 = arith.mulf %27, %cst_18 : f32
    %c0_19 = arith.constant 0 : index
    %c0_20 = arith.constant 0 : index
    %29 = memref.load %arg8[%c0_19, %c0_20] : memref<1x1xf32, #tpu.memory_space<smem>>
    memref.store %28, %arg8[%c0_19, %c0_20] : memref<1x1xf32, #tpu.memory_space<smem>>
    return
  }
}

</mosaic_0001>

<bundles_post_ra>
// kernel: tpu_custom_call.1
= control target key start
LH: loop header
LB: loop body
LE: loop exit
PB: predicated region body
PF: predicated region fallthrough
CT: control target
= control target key end

     0   :  { %13 = vsyncpa [#allocation3], 0  ;;  %s674_s0 = inlined_call_operand.vmem [shape: f32[4,512], index: 0, kind: input, shape index: {}]   ;;  %s675_s1 = inlined_call_operand.hbm [shape: f32[4,512], index: 1, kind: input, shape index: {}]   ;;  %s676_s2 = inlined_call_operand.vmem [shape: f32[1,512], index: 2, kind: input, shape index: {}]   ;;  %s677_s3 = inlined_call_operand.vmem [shape: f32[1,512], index: 3, kind: input, shape index: {}]   ;;  %s678_s4 = inlined_call_operand.hbm [shape: f32[32,512], index: 4, kind: input, shape index: {}]   ;;  %s679_s5 = inlined_call_operand.vmem [shape: bf16[32,4], index: 5, kind: input, shape index: {}]   ;;  %s680_s6 = inlined_call_operand.vmem [shape: bf16[4,32], index: 6, kind: input, shape index: {}]   ;;  %s681_s7 = inlined_call_operand.vmem [shape: f32[4,1], index: 7, kind: input, shape index: {}]   ;;  %s682_s8 = inlined_call_operand.hbm [shape: f32[1,1], index: 8, kind: output, shape index: {}]  }
   0x1   :  { %14 = vsyncpa [#allocation6], 0 }
   0x2   :  { %15 = vsyncpa [#allocation4], 0  ;;  %s544_s27 = smov [#allocation2]   ;;  %s545_s29 = smov [#allocation5]  }
   0x3   :  { %s24_s28 = sshll.u32 %s544_s27, 4  ;;  %s37_s30 = sshll.u32 %s545_s29, 4  ;;  %s25_s28 = int_to_ptr.vmem [resolvable:$true] %s24_s28  ;;  %s595_s30 = int_to_ptr.vmem [resolvable:$true] %s37_s30 }
   0x4   :  { %s484_s11 = scalar_lea.hbm %s675_s1, 256 }
   0x5   :  { %p485_p0 = scmp.ne.s32.totalorder %s675_s1, %s484_s11  ;;  %p488_p1 = scmp.lt.u32.totalorder %s484_s11, %s675_s1 }
   0x7   :  { %p490_p2 = pnand %p488_p1, %p485_p0 }
   0x9   :  { %493 = shalt.err (!%p490_p2)
}
   0xa   :  { %s494_s16 = scalar_lea.vmem %s25_s28, 256  ;;  %p499_p4 = scmp.lt.s32.totalorder %s25_s28, %s25_s28 }
   0xb   :  { %p495_p3 = scmp.ne.s32.totalorder %s25_s28, %s494_s16  ;;  %p500_p5 = scmp.lt.s32.totalorder %s494_s16, %s494_s16 }
   0xd   :  { %p501_p6 = por %p500_p5, %p499_p4 }
   0xf   :  { %p502_p7 = pnand %p501_p6, %p495_p3 }
  0x11   :  { %505 = shalt.err (!%p502_p7)
}
  0x12   :  { %27 = dma.hbm_to_vmem [thread:$0]  %s675_s1, 256, %s25_s28, [#allocation3]  }
  0x13   :  { %s506_s21 = scalar_lea.hbm %s678_s4, 2048 }
  0x14   :  { %p507_p8 = scmp.ne.s32.totalorder %s678_s4, %s506_s21  ;;  %p510_p9 = scmp.lt.u32.totalorder %s506_s21, %s678_s4 }
  0x16   :  { %p512_p10 = pnand %p510_p9, %p507_p8 }
  0x18   :  { %515 = shalt.err (!%p512_p10)
}
  0x19   :  { %s516_s26 = scalar_lea.vmem %s595_s30, 2048  ;;  %p521_p12 = scmp.lt.s32.totalorder %s595_s30, %s595_s30 }
  0x1a   :  { %p517_p11 = scmp.ne.s32.totalorder %s595_s30, %s516_s26  ;;  %p522_p13 = scmp.lt.s32.totalorder %s516_s26, %s516_s26 }
  0x1c   :  { %p523_p0 = por %p522_p13, %p521_p12 }
  0x1e   :  { %p524_p1 = pnand %p523_p0, %p517_p11 }
  0x20   :  { %527 = shalt.err (!%p524_p1)
}
  0x21   :  { %s546_s1 = smov 512   ;;  %s547_s27 = smov 32  }
  0x22   :  { %43 = dma.hbm_to_vmem [thread:$0]  %s678_s4, 2048, %s595_s30, [#allocation6], %s546_s1, %s546_s1, %s547_s27  }
  0x23   :  { %538 = dma.done.wait [#allocation3], 256  }
  0x24   :  { %539 = vsyncadd [#allocation3], 4294967040 }
  0x25   :  { %540 = dma.done.wait [#allocation6], 2048  }
  0x26   :  { %541 = vsyncadd [#allocation6], 4294965248  ;;  %v63_v0 = vlaneseq  ;;  %v548_v1 = vmov 0   ;;  %v57_v7 = vld [vmem:[%s674_s0] sm:$0xff]  ;;  %v58_v14 = vld [vmem:[%s674_s0 + $0x8] sm:$0xff]  ;;  %vm170_vm0 = vcmask 1041408  }
  0x27   :  { %215 = vmatprep.mubr.bf16.mxu0 %v548_v1  ;;  %268 = vmatprep.mubr.bf16.mxu1 %v548_v1  ;;  %v629_v8 = vld [vmem:[#allocation2] sm:$0xff]  ;;  %v85_v11 = vcombine.high %v57_v7, %v57_v7  ;;  %v642_v15 = vld [vmem:[#allocation2 + $0x8] sm:$0xff]  ;;  %v86_v18 = vcombine.high %v58_v14, %v58_v14  ;;  %vm163_vm1 = vcmask 31744   ;;  %v137_v46 = vld [vmem:[#allocation5] sm:$0xff]  ;;  %vm320_vm2 = vcmask 261120   ;;  %s528_s21 = scalar_lea.hbm %s682_s8, 16 }
  0x28   :  { %v64_v2 = vshrl.u32 %v63_v0, 7  ;;  %477 = vset.pattern.permute.xlu0 %v548_v1  ;;  %v61_v9 = vld [vmem:[%s676_s2] sm:$0xf]  ;;  %v117_v13 = vcombine.high %v629_v8, %v629_v8  ;;  %v118_v20 = vcombine.high %v642_v15, %v642_v15  ;;  %v483_v44 = vld [vmem:[%s679_s5 + $0x8] sm:$0xff]   ;;  %v138_v48 = vld [vmem:[#allocation5 + $0x8] sm:$0xff]  ;;  %vm424_vm3 = vcmask 1043456   ;;  %p529_p2 = scmp.ne.s32.totalorder %s682_s8, %s528_s21  ;;  %p532_p3 = scmp.lt.u32.totalorder %s528_s21, %s682_s8 }
  0x29   :  { %v93_v12 = vld [vmem:[%s677_s3] sm:$0xf]  ;;  %v140_v50 = vld [vmem:[#allocation5 + $0x18] sm:$0xff]  ;;  %v141_v51 = vld [vmem:[#allocation5 + $0x20] sm:$0xff] }
  0x2a   :  { %v69_v3 = vsub.s32 1, %v64_v2  ;;  %v77_v4 = vsub.s32 3, %v64_v2  ;;  %v65_v5 = vsub.s32 0, %v64_v2  ;;  %v73_v6 = vsub.s32 2, %v64_v2  ;;  %v482_v42 = vld [vmem:[%s679_s5] sm:$0xff]   ;;  %v142_v56 = vld [vmem:[#allocation5 + $0x28] sm:$0xff]  ;;  %p534_p4 = pnand %p532_p3, %p529_p2 }
  0x2b   :  { %v314_v45 = vld [vmem:[%s681_s7] sm:$0xf]  ;;  %v144_v61 = vld [vmem:[#allocation5 + $0x38] sm:$0xff] }
  0x2c   :  { %v70_v10 = vrot.slane %v61_v9, %v69_v3  ;;  %v78_v16 = vrot.slane %v61_v9, %v77_v4  ;;  %v102_v17 = vrot.slane %v93_v12, %v69_v3  ;;  %v110_v19 = vrot.slane %v93_v12, %v77_v4  ;;  %317 = vperm.xlu0 %477, %v314_v45   ;;  %v139_v47 = vld [vmem:[#allocation5 + $0x10] sm:$0xff] }
  0x2d   :  { %v66_v22 = vrot.slane %v61_v9, %v65_v5  ;;  %v98_v23 = vrot.slane %v93_v12, %v65_v5  ;;  %v74_v24 = vrot.slane %v61_v9, %v73_v6  ;;  %v106_v28 = vrot.slane %v93_v12, %v73_v6  ;;  %v143_v55 = vld [vmem:[#allocation5 + $0x30] sm:$0xff] }
  0x2e   :  { %v90_v21 = vmul.f32 %v85_v11, %v70_v10  ;;  %v122_v25 = vmul.f32 %v117_v13, %v102_v17  ;;  %v92_v26 = vmul.f32 %v86_v18, %v78_v16  ;;  %v124_v27 = vmul.f32 %v118_v20, %v110_v19  ;;  %v147_v18 = vld [vmem:[#allocation5 + $0x50] sm:$0xff]  ;;  %v146_v19 = vld [vmem:[#allocation5 + $0x48] sm:$0xff] }
  0x2f   :  { %v89_v29 = vmul.f32 %v66_v22, %v57_v7  ;;  %v121_v30 = vmul.f32 %v98_v23, %v629_v8  ;;  %v91_v31 = vmul.f32 %v74_v24, %v58_v14  ;;  %v123_v34 = vmul.f32 %v106_v28, %v642_v15  ;;  %v145_v14 = vld [vmem:[#allocation5 + $0x40] sm:$0xff]  ;;  %v148_v23 = vld [vmem:[#allocation5 + $0x58] sm:$0xff] }
  0x30   :  { %v126_v32 = vadd.f32 %v122_v25, %v90_v21  ;;  %v128_v33 = vadd.f32 %v124_v27, %v92_v26  ;;  %v149_v24 = vld [vmem:[#allocation5 + $0x60] sm:$0xff] }
  0x31   :  { %v125_v35 = vadd.f32 %v121_v30, %v89_v29  ;;  %v127_v38 = vadd.f32 %v123_v34, %v91_v31  ;;  %v151_v29 = vld [vmem:[#allocation5 + $0x70] sm:$0xff]  ;;  %v150_v30 = vld [vmem:[#allocation5 + $0x68] sm:$0xff] }
  0x32   :  { %v134_v36 = vpack.c.bf16 %v126_v32, %v126_v32  ;;  %v136_v37 = vpack.c.bf16 %v128_v33, %v128_v33 }
  0x33   :  { %v133_v39 = vpack.c.bf16 %v125_v35, %v125_v35  ;;  %v135_v40 = vpack.c.bf16 %v127_v38, %v127_v38  ;;  %v152_v35 = vld [vmem:[#allocation5 + $0x78] sm:$0xff] }
  0x34   :  { %461 = vmatprep.subr.msk.bf16.mxu0 %vm170_vm0, %v134_v36  ;;  %464 = vmatprep.subr.msk.bf16.mxu1 %vm170_vm0, %v136_v37 }
  0x35   :  { %v172_v41 = vsel %vm170_vm0, %v133_v39, 0  ;;  %v178_v43 = vsel %vm170_vm0, %v135_v40, 0 }
  0x36   :  { %184 = vmatpush1.bf16.msra.mxu0 %v172_v41  ;;  %237 = vmatpush1.bf16.msra.mxu1 %v178_v43 }
  0x39   :  { %462 = vmatmul.mubr.msk.bf16.vlgmr.msra.gmra.mrb[0].mxu0 %vm163_vm1, %v482_v42  ;;  %465 = vmatmul.mubr.msk.bf16.vlgmr.msra.gmra.mrb[0].mxu1 %vm163_vm1, %v482_v42 }
  0x3a   :  { %225 = vmatprep.mubr.bf16.mxu0 %v548_v1  ;;  %278 = vmatprep.mubr.bf16.mxu1 %v548_v1 }
  0x41   :  { %463 = vmatmul.mubr.msk.bf16.gmra.mrb[4].mxu0 %vm163_vm1, %v483_v44  ;;  %466 = vmatmul.mubr.msk.bf16.gmra.mrb[4].mxu1 %vm163_vm1, %v483_v44 }
  0x42   :  { %356 = vmatprep.mubr.bf16.mxu0 %v548_v1  ;;  %397 = vmatprep.mubr.bf16.mxu1 %v548_v1 }
 0x10c   :  { %v217_v49 = vpop.f32.mrb[0].mxu0  ;;  %v270_v53 = vpop.f32.mrb[0].mxu1 }
 0x10d   :  { %v218_v52 = vadd.f32 %v217_v49, %v137_v46  ;;  %v219_v54 = vpop.f32.mrb[1].mxu0  ;;  %v271_v57 = vadd.f32 %v270_v53, %v139_v47  ;;  %v272_v59 = vpop.f32.mrb[1].mxu1 }
 0x10e   :  { %v220_v58 = vadd.f32 %v219_v54, %v138_v48  ;;  %v221_v60 = vpop.f32.mrb[2].mxu0  ;;  %v273_v62 = vadd.f32 %v272_v59, %v140_v50  ;;  %v274_v0 = vpop.f32.mrb[2].mxu1 }
 0x10f   :  { %v222_v63 = vadd.f32 %v221_v60, %v141_v51  ;;  %v223_v1 = vpop.f32.mrb[3].mxu0  ;;  %v291_v2 = vmax.f32 %v271_v57, 0.0  ;;  %v275_v3 = vadd.f32 %v274_v0, %v143_v55  ;;  %v276_v5 = vpop.f32.mrb[3].mxu1  ;;  %v289_v6 = vmax.f32 %v218_v52, 0.0 }
 0x110   :  { %v224_v4 = vadd.f32 %v223_v1, %v142_v56  ;;  %v292_v7 = vmax.f32 %v273_v62, 0.0  ;;  %v277_v10 = vadd.f32 %v276_v5, %v144_v61  ;;  %v290_v11 = vmax.f32 %v220_v58, 0.0  ;;  %v305_v56 = vld [vmem:[%s680_s6] sm:$0x3]  ;;  %v318_v57 = vpop.permute.xlu0 %317 }
 0x111   :  { %v293_v9 = vmax.f32 %v222_v63, 0.0  ;;  %v295_v12 = vmax.f32 %v275_v3, 0.0 }
 0x112   :  { %v294_v13 = vmax.f32 %v224_v4, 0.0  ;;  %v296_v17 = vmax.f32 %v277_v10, 0.0 }
 0x113   :  { %v306_v16 = vpack.c.bf16 %v293_v9, %v289_v6  ;;  %v308_v20 = vpack.c.bf16 %v295_v12, %v291_v2 }
 0x114   :  { %v307_v21 = vpack.c.bf16 %v294_v13, %v290_v11  ;;  %v227_v22 = vpop.f32.mrb[4].mxu0  ;;  %v309_v25 = vpack.c.bf16 %v296_v17, %v292_v7  ;;  %v280_v27 = vpop.f32.mrb[4].mxu1 }
 0x115   :  { %v228_v26 = vadd.f32 %v227_v22, %v145_v14  ;;  %v229_v28 = vpop.f32.mrb[5].mxu0  ;;  %v281_v31 = vadd.f32 %v280_v27, %v147_v18  ;;  %v282_v33 = vpop.f32.mrb[5].mxu1 }
 0x116   :  { %v230_v32 = vadd.f32 %v229_v28, %v146_v19  ;;  %v231_v34 = vpop.f32.mrb[6].mxu0  ;;  %324 = vmatprep.subr.bf16.mxu0 %v307_v21  ;;  %v283_v36 = vadd.f32 %v282_v33, %v148_v23  ;;  %v284_v38 = vpop.f32.mrb[6].mxu1  ;;  %365 = vmatprep.subr.bf16.mxu1 %v309_v25 }
 0x117   :  { %v232_v37 = vadd.f32 %v231_v34, %v149_v24  ;;  %v233_v39 = vpop.f32.mrb[7].mxu0  ;;  %325 = vmatpush1.bf16.msra.mxu0 %v306_v16  ;;  %v299_v40 = vmax.f32 %v281_v31, 0.0  ;;  %v285_v41 = vadd.f32 %v284_v38, %v151_v29  ;;  %v286_v43 = vpop.f32.mrb[7].mxu1  ;;  %366 = vmatpush1.bf16.msra.mxu1 %v308_v20  ;;  %v297_v44 = vmax.f32 %v228_v26, 0.0 }
 0x118   :  { %v234_v42 = vadd.f32 %v233_v39, %v150_v30  ;;  %v300_v45 = vmax.f32 %v283_v36, 0.0  ;;  %v287_v47 = vadd.f32 %v286_v43, %v152_v35  ;;  %v298_v48 = vmax.f32 %v230_v32, 0.0 }
 0x119   :  { %v301_v46 = vmax.f32 %v232_v37, 0.0  ;;  %v303_v49 = vmax.f32 %v285_v41, 0.0 }
 0x11a   :  { %v302_v50 = vmax.f32 %v234_v42, 0.0  ;;  %v304_v52 = vmax.f32 %v287_v47, 0.0 }
 0x11b   :  { %v310_v51 = vpack.c.bf16 %v301_v46, %v297_v44  ;;  %v312_v53 = vpack.c.bf16 %v303_v49, %v299_v40 }
 0x11c   :  { %v311_v54 = vpack.c.bf16 %v302_v50, %v298_v48  ;;  %v313_v55 = vpack.c.bf16 %v304_v52, %v300_v45 }
 0x11e   :  { %326 = vmatprep.subr.bf16.mxu0 %v311_v54  ;;  %367 = vmatprep.subr.bf16.mxu1 %v313_v55 }
 0x11f   :  { %327 = vmatpush1.bf16.msra.mxu0 %v310_v51  ;;  %368 = vmatpush1.bf16.msra.mxu1 %v312_v53 }
 0x122   :  { %467 = vmatmul.mubr.msk.bf16.vlgmr.msra.gmra.mrb[8].mxu0 %vm320_vm2, %v305_v56  ;;  %468 = vmatmul.mubr.msk.bf16.vlgmr.msra.gmra.mrb[8].mxu1 %vm320_vm2, %v305_v56 }
 0x1f5   :  { %v358_v58 = vpop.f32.mrb[8].mxu0  ;;  %v399_v61 = vpop.f32.mrb[8].mxu1 }
 0x1f6   :  { %v359_v59 = vadd.f32 %v358_v58, %v318_v57  ;;  %v360_v60 = vpop.f32.mrb[9].mxu0  ;;  %v400_v0 = vadd.f32 %v399_v61, %v318_v57  ;;  %v401_v1 = vpop.f32.mrb[9].mxu1 }
 0x1f7   :  { %v361_v62 = vadd.f32 %v360_v60, %v318_v57  ;;  %v362_v63 = vpop.f32.mrb[10].mxu0  ;;  %v402_v3 = vadd.f32 %v401_v1, %v318_v57  ;;  %v403_v4 = vpop.f32.mrb[10].mxu1 }
 0x1f8   :  { %v363_v2 = vpop.f32.mrb[11].mxu0  ;;  %v404_v6 = vpop.f32.mrb[11].mxu1 }
 0x1f9   :  { %v410_v5 = vcombine.low %v359_v59, %v361_v62  ;;  %v411_v7 = vcombine.low %v400_v0, %v402_v3 }
 0x1fb   :  { %v414_v9 = vsub.f32 %v629_v8, %v410_v5  ;;  %v415_v10 = vsub.f32 %v642_v15, %v411_v7 }
 0x1fd   :  { %v416_v11 = vmul.f32 %v414_v9, %v414_v9  ;;  %v417_v12 = vmul.f32 %v415_v10, %v415_v10 }
 0x1ff   :  { %v420_v13 = vcombine.high %v416_v11, %v416_v11  ;;  %v421_v14 = vcombine.high %v417_v12, %v417_v12  ;;  %v425_v16 = vsel %vm424_vm3, %v416_v11, 0.0  ;;  %v428_v19 = vsel %vm424_vm3, %v417_v12, 0.0 }
 0x201   :  { %v426_v17 = vsel %vm424_vm3, %v420_v13, 0.0  ;;  %v430_v21 = vsel %vm424_vm3, %v421_v14, 0.0 }
 0x202   :  { %v427_v18 = vadd.f32 %v426_v17, %v425_v16 }
 0x204   :  { %v429_v20 = vadd.f32 %v428_v19, %v427_v18 }
 0x206   :  { %v431_v22 = vadd.f32 %v430_v21, %v429_v20 }
 0x208   :  { %432 = vadd.xlane.f32.xlu0 %v431_v22 }
 0x295   :  { %v433_v23 = vpop.xlane.xlu0 %432 }
 0x296   :  { %v434_v24 = vrot.slane %v433_v23, 4 }
 0x298   :  { %v435_v25 = vadd.f32 %v434_v24, %v433_v23 }
 0x29a   :  { %v436_v26 = vrot.slane %v435_v25, 2 }
 0x29c   :  { %v437_v8 = vadd.f32 %v436_v26, %v435_v25 }
 0x29e   :  { %v438_v27 = vrot.slane %v437_v8, 1 }
 0x2a0   :  { %v439_v15 = vadd.f32 %v438_v27, %v437_v8 }
 0x2a2   :  { %469 = vpush %v439_v15 }
 0x2d3   :  { %s470_s6 = spop %469 }
 0x2d4   :  { %s441_s18 = smul.f32 0.00048828125, %s470_s6 }
 0x2d6   :  { %443 = sst [smem:[#allocation7]] %s441_s18 }
 0x2d7   :  { %537 = shalt.err (!%p534_p4)
}
 0x2d8   :  { %s549_s26 = smov [#allocation7]  }
 0x2d9   :  { %451 = dma.smem_to_hbm %s549_s26, 16, %s682_s8, [#allocation4]  }
 0x2da   :  { %542 = dma.done.wait [#allocation4], 16  }
 0x2db   :  { %543 = vsyncadd [#allocation4], 4294967280 }
 0x2dc   :  { %455 = sfence }
 0x2dd   :  { %456 = vsyncpa [#allocation3], 1 }
 0x2de   :  { %457 = vsyncpa [#allocation6], 1 }
 0x2df   :  { %458 = vsyncpa [#allocation4], 1 }

</bundles_post_ra>
